<compile_context>
chip_gen: v7x
topology: tpu7x:2x2x1
jax: 0.10.0
libtpu: 0.0.40
codegen_flags: <defaults>
</compile_context>

<pallas_src>
import functools

import jax
import jax.numpy as jnp
from jax import lax
from jax.experimental import pallas as pl
from jax.experimental.pallas import tpu as pltpu

LANE = 128


# -----------------------------------------------------------------------------
# helpers
# -----------------------------------------------------------------------------
def _static_int_pow(x, n):
    """x**n for a static positive Python int n as a chain of VPU multiplies."""
    assert isinstance(n, int) and n >= 1
    result = None
    base = x
    while n:
        if n & 1:
            result = base if result is None else result * base
        n >>= 1
        if n:
            base = base * base
    return result


# -----------------------------------------------------------------------------
# kernel: entire compute_openmax fused, everything resident in VMEM, no grid
# -----------------------------------------------------------------------------
def openmax_kernel(logits_ref, feat_ref, mean_t_ref, params_ref, o_ref, *,
                   alpha, num_classes):
    # ---- L2 distance of sample 0 to every class mean (MXU decomposition) ----
    #   d^2 = ||f||^2 + ||m_c||^2 - 2 f . m_c
    feat = feat_ref[...].astype(jnp.float32)                      # (1, F) lane-dense
    cross = jnp.dot(feat, mean_t_ref[...],
                    preferred_element_type=jnp.float32)           # (1, Cp)  MXU
    feat_sq = jnp.sum(feat * feat, axis=1, keepdims=True)         # (1, 1)   lane reduce

    c_shape = params_ref[0:1, :]                                  # (1, Cp)
    loc = params_ref[1:2, :]
    inv_scale = params_ref[2:3, :]                                # 1/scale, precomputed
    mean_sq = params_ref[3:4, :]                                  # ||m_c||^2, precomputed

    d2 = feat_sq + mean_sq - 2.0 * cross
    d = jnp.sqrt(jnp.maximum(d2, 0.0))                            # (1, Cp)

    # ---- per-class Weibull CDF:  weibull_min.cdf(d, c, loc, scale) ----------
    z = (d - loc) * inv_scale
    z_safe = jnp.maximum(z, 1e-30)
    z_pow_c = jnp.exp(c_shape * jnp.log(z_safe))                  # z ** c (EUP)
    w = jnp.where(z > 0.0, 1.0 - jnp.exp(-z_pow_c), 0.0)          # cdf, 0 for x<loc

    # ---- OpenMax re-weighting + softmax over (real) classes ------------------
    factor = 1.0 - _static_int_pow(w, alpha)                      # (1, Cp)
    scores = logits_ref[...].astype(jnp.float32) * factor         # (B, Cp)
    lane_id = lax.broadcasted_iota(jnp.int32, scores.shape, 1)
    scores = jnp.where(lane_id < num_classes, scores, -1e30)      # mask padded classes
    m = jnp.max(scores, axis=1, keepdims=True)
    e = jnp.exp(scores - m)                                       # == exp/sum of reference
    o_ref[...] = (e / jnp.sum(e, axis=1, keepdims=True)).astype(o_ref.dtype)


# -----------------------------------------------------------------------------
# wrapper
# -----------------------------------------------------------------------------
def openmax_forward(logits, features, mean_vecs_t_pad, cls_params_pad, *, alpha=10):
    """logits: (B, C); features: (B, ...); mean_vecs_t_pad: (F, Cp);
    cls_params_pad: (4, Cp) rows = (c, loc, 1/scale, ||mean||^2)."""
    b, ncls = logits.shape
    _, cpad = mean_vecs_t_pad.shape

    feats = features.reshape(b, -1)                 # features.view(B, -1)
    # Reference uses dists.flatten()[i] for i in range(C): only batch element 0
    # contributes to the Weibull scores.  Pass its feature vector as a lane-dense row.
    feat0_row = feats[0:1, :]                       # (1, F)
    logits_pad = jnp.pad(logits, ((0, 0), (0, cpad - ncls)))      # lane-dense (B, Cp)

    kernel = functools.partial(openmax_kernel, alpha=int(alpha),
                               num_classes=int(ncls))
    probs_pad = pl.pallas_call(
        kernel,
        out_shape=jax.ShapeDtypeStruct((b, cpad), logits.dtype),
        in_specs=[
            pl.BlockSpec(memory_space=pltpu.MemorySpace.VMEM),    # logits (padded)
            pl.BlockSpec(memory_space=pltpu.MemorySpace.VMEM),    # feat of sample 0
            pl.BlockSpec(memory_space=pltpu.MemorySpace.VMEM),    # mean vectors (F, Cp)
            pl.BlockSpec(memory_space=pltpu.MemorySpace.VMEM),    # per-class params (4, Cp)
        ],
        out_specs=pl.BlockSpec(memory_space=pltpu.MemorySpace.VMEM),
    )(logits_pad, feat0_row, mean_vecs_t_pad, cls_params_pad)
    return probs_pad[:, :ncls]


# -----------------------------------------------------------------------------
# pure-JAX reference (mirrors the PyTorch code, including the dists[i] quirk)
# -----------------------------------------------------------------------------
def openmax_reference(logits, features, mean_vecs, weibull, alpha=10):
    b, ncls = logits.shape
    feats = features.reshape(b, -1)
    dists = jnp.linalg.norm(feats[:, None, :] - mean_vecs[None, :, :],
                            axis=2).reshape(-1)
    d = dists[:ncls]                                              # == dists[i], i<C
    c, loc, scale = weibull
    z = (d - loc) / scale
    z_safe = jnp.maximum(z, 1e-30)
    w = jnp.where(z > 0.0, 1.0 - jnp.exp(-(z_safe ** c)), 0.0)
    scores = logits * (1.0 - w ** alpha)[None, :]
    e = jnp.exp(scores)
    return e / jnp.sum(e, axis=1, keepdims=True)


# -----------------------------------------------------------------------------
# synthetic layer state (what fit_weibull would have produced), pre-packed for
# the kernel: classes padded to a lane-dense 128, 1/scale and ||mean||^2 folded
# in host-side (static state, so this precompute is free).
# -----------------------------------------------------------------------------
def init_openmax_state(key, num_classes, num_features):
    km, kc, kl, ks = jax.random.split(key, 4)
    mean_vecs = jax.random.normal(km, (num_classes, num_features), jnp.float32)
    # per-class weibull_min params (shape c, loc, scale), chosen so the CDF is
    # non-degenerate at typical ||f - mean|| ~ sqrt(2F).
    shape_c = 1.5 + jax.random.uniform(kc, (num_classes,), jnp.float32)
    loc = 18.0 + 4.0 * jax.random.uniform(kl, (num_classes,), jnp.float32)
    scale = 1.0 + 2.0 * jax.random.uniform(ks, (num_classes,), jnp.float32)

    cpad = max(LANE, ((num_classes + LANE - 1) // LANE) * LANE)
    pad = cpad - num_classes

    mean_t_pad = jnp.pad(mean_vecs.T, ((0, 0), (0, pad)))         # (F, Cp), lanes = classes
    mean_sq = jnp.sum(mean_t_pad * mean_t_pad, axis=0)            # (Cp,)  ||mean||^2, 0 on pad
    c_pad = jnp.pad(shape_c, (0, pad), constant_values=1.0)       # benign params on pad lanes
    loc_pad = jnp.pad(loc, (0, pad), constant_values=0.0)
    inv_scale_pad = jnp.pad(1.0 / scale, (0, pad), constant_values=1.0)
    cls_params = jnp.stack([c_pad, loc_pad, inv_scale_pad, mean_sq], axis=0)   # (4, Cp)

    return {
        # kernel-ready static state
        "mean_vecs_t_pad": mean_t_pad,
        "cls_params_pad": cls_params,
        # raw state for the pure-JAX reference
        "mean_vecs": mean_vecs,
        "weibull": (shape_c, loc, scale),
    }


if __name__ == "__main__":
    B, C, F = 4, 10, 256       # batch, num_classes, num_features
    ALPHA = 10

    key = jax.random.PRNGKey(0)
    kl_, kf_, kp_ = jax.random.split(key, 3)
    logits = jax.random.normal(kl_, (B, C), jnp.float32)
    features = jax.random.normal(kf_, (B, F), jnp.float32)
    state = init_openmax_state(kp_, C, F)

    fwd = jax.jit(functools.partial(openmax_forward, alpha=ALPHA))
    probs = fwd(logits, features, state["mean_vecs_t_pad"], state["cls_params_pad"])
    probs = jax.block_until_ready(probs)

    assert probs.shape == (B, C), probs.shape
    # mirror the reference forward()'s NaN guard (host-side)
    if bool(jnp.isnan(probs).any()):
        raise ValueError("NaN values detected after openmax layer")
    # probabilities sum to 1 over classes
    assert bool(jnp.allclose(jnp.sum(probs, axis=1), 1.0, atol=1e-5))
    # numerical check against the pure-JAX reference
    ref = openmax_reference(logits, features, state["mean_vecs"],
                            state["weibull"], alpha=ALPHA)
    assert bool(jnp.allclose(probs, ref, rtol=1e-2, atol=2e-3)), (
        float(jnp.max(jnp.abs(probs - ref))))

    print("KERNEL_OK")
</pallas_src>

<mosaic_0001>
module attributes {stable_mosaic.version = 11 : i64} {
  func.func @openmax_kernel(%arg0: memref<4x128xf32, #tpu.memory_space<vmem>>, %arg1: memref<1x256xf32, #tpu.memory_space<vmem>>, %arg2: memref<256x128xf32, #tpu.memory_space<vmem>>, %arg3: memref<4x128xf32, #tpu.memory_space<vmem>>, %arg4: memref<4x128xf32, #tpu.memory_space<vmem>>) attributes {dimension_semantics = [], scalar_prefetch = 0 : i64, scratch_operands = 0 : i64, tpu.core_type = #tpu.core_type<tc>} {
    %c0 = arith.constant 0 : index
    %c0_0 = arith.constant 0 : index
    %0 = vector.load %arg1[%c0, %c0_0] : memref<1x256xf32, #tpu.memory_space<vmem>>, vector<1x256xf32>
    %c0_1 = arith.constant 0 : index
    %c0_2 = arith.constant 0 : index
    %1 = vector.load %arg2[%c0_1, %c0_2] : memref<256x128xf32, #tpu.memory_space<vmem>>, vector<256x128xf32>
    %cst = arith.constant dense<0.000000e+00> : vector<1x128xf32>
    %2 = tpu.matmul %0, %1, %cst {dimension_numbers = #tpu.dot_dimension_numbers<[1], [0], [0], [1], [0, 0, 1, 1], [], []>} : vector<1x256xf32>, vector<256x128xf32>, vector<1x128xf32> -> vector<1x128xf32>
    %3 = arith.mulf %0, %0 : vector<1x256xf32>
    %cst_3 = arith.constant dense<0.000000e+00> : vector<1xf32>
    %4 = vector.multi_reduction <add>, %3, %cst_3 [1] : vector<1x256xf32> to vector<1xf32>
    %5 = vector.shape_cast %4 : vector<1xf32> to vector<1x1xf32>
    %c0_4 = arith.constant 0 : index
    %c0_5 = arith.constant 0 : index
    %6 = vector.load %arg3[%c0_4, %c0_5] : memref<4x128xf32, #tpu.memory_space<vmem>>, vector<1x128xf32>
    %c1 = arith.constant 1 : index
    %c0_6 = arith.constant 0 : index
    %7 = vector.load %arg3[%c1, %c0_6] : memref<4x128xf32, #tpu.memory_space<vmem>>, vector<1x128xf32>
    %c2 = arith.constant 2 : index
    %c0_7 = arith.constant 0 : index
    %8 = vector.load %arg3[%c2, %c0_7] : memref<4x128xf32, #tpu.memory_space<vmem>>, vector<1x128xf32>
    %c3 = arith.constant 3 : index
    %c0_8 = arith.constant 0 : index
    %9 = vector.load %arg3[%c3, %c0_8] : memref<4x128xf32, #tpu.memory_space<vmem>>, vector<1x128xf32>
    %10 = vector.broadcast %5 : vector<1x1xf32> to vector<1x128xf32>
    %11 = arith.addf %10, %9 : vector<1x128xf32>
    %cst_9 = arith.constant 2.000000e+00 : f32
    %12 = vector.broadcast %cst_9 : f32 to vector<1x128xf32>
    %13 = arith.mulf %12, %2 : vector<1x128xf32>
    %14 = arith.subf %11, %13 : vector<1x128xf32>
    %cst_10 = arith.constant 0.000000e+00 : f32
    %15 = vector.broadcast %cst_10 : f32 to vector<1x128xf32>
    %16 = arith.maximumf %14, %15 : vector<1x128xf32>
    %17 = math.sqrt %16 : vector<1x128xf32>
    %18 = arith.subf %17, %7 : vector<1x128xf32>
    %19 = arith.mulf %18, %8 : vector<1x128xf32>
    %cst_11 = arith.constant 1.000000e-30 : f32
    %20 = vector.broadcast %cst_11 : f32 to vector<1x128xf32>
    %21 = arith.maximumf %19, %20 : vector<1x128xf32>
    %22 = math.log %21 : vector<1x128xf32>
    %23 = arith.mulf %6, %22 : vector<1x128xf32>
    %24 = math.exp %23 : vector<1x128xf32>
    %cst_12 = arith.constant 0.000000e+00 : f32
    %25 = vector.broadcast %cst_12 : f32 to vector<1x128xf32>
    %26 = arith.cmpf ogt, %19, %25 : vector<1x128xf32>
    %cst_13 = arith.constant 0.000000e+00 : f32
    %27 = vector.broadcast %cst_13 : f32 to vector<1x128xf32>
    %28 = arith.subf %27, %24 : vector<1x128xf32>
    %29 = math.exp %28 : vector<1x128xf32>
    %cst_14 = arith.constant 1.000000e+00 : f32
    %30 = vector.broadcast %cst_14 : f32 to vector<1x128xf32>
    %31 = arith.subf %30, %29 : vector<1x128xf32>
    %cst_15 = arith.constant 0.000000e+00 : f32
    %32 = vector.broadcast %cst_15 : f32 to vector<1x128xf32>
    %33 = arith.select %26, %31, %32 : vector<1x128xi1>, vector<1x128xf32>
    %34 = arith.mulf %33, %33 : vector<1x128xf32>
    %35 = arith.mulf %34, %34 : vector<1x128xf32>
    %36 = arith.mulf %35, %35 : vector<1x128xf32>
    %37 = arith.mulf %34, %36 : vector<1x128xf32>
    %cst_16 = arith.constant 1.000000e+00 : f32
    %38 = vector.broadcast %cst_16 : f32 to vector<1x128xf32>
    %39 = arith.subf %38, %37 : vector<1x128xf32>
    %c0_17 = arith.constant 0 : index
    %c0_18 = arith.constant 0 : index
    %40 = vector.load %arg0[%c0_17, %c0_18] : memref<4x128xf32, #tpu.memory_space<vmem>>, vector<4x128xf32>
    %41 = vector.broadcast %39 : vector<1x128xf32> to vector<4x128xf32>
    %42 = arith.mulf %40, %41 : vector<4x128xf32>
    %43 = tpu.iota {dimensions = array<i32: 1>} : vector<4x128xi32>
    %c10_i32 = arith.constant 10 : i32
    %44 = vector.broadcast %c10_i32 : i32 to vector<4x128xi32>
    %45 = arith.cmpi slt, %43, %44 : vector<4x128xi32>
    %cst_19 = arith.constant -1.000000e+30 : f32
    %46 = vector.broadcast %cst_19 : f32 to vector<4x128xf32>
    %47 = arith.select %45, %42, %46 : vector<4x128xi1>, vector<4x128xf32>
    %cst_20 = arith.constant dense<0xFF800000> : vector<4xf32>
    %48 = vector.multi_reduction <maximumf>, %47, %cst_20 [1] : vector<4x128xf32> to vector<4xf32>
    %49 = vector.shape_cast %48 : vector<4xf32> to vector<4x1xf32>
    %50 = vector.broadcast %49 : vector<4x1xf32> to vector<4x128xf32>
    %51 = arith.subf %47, %50 : vector<4x128xf32>
    %52 = math.exp %51 : vector<4x128xf32>
    %cst_21 = arith.constant dense<0.000000e+00> : vector<4xf32>
    %53 = vector.multi_reduction <add>, %52, %cst_21 [1] : vector<4x128xf32> to vector<4xf32>
    %54 = vector.shape_cast %53 : vector<4xf32> to vector<4x1xf32>
    %55 = vector.broadcast %54 : vector<4x1xf32> to vector<4x128xf32>
    %56 = arith.divf %52, %55 : vector<4x128xf32>
    %c0_22 = arith.constant 0 : index
    %c0_23 = arith.constant 0 : index
    %57 = vector.load %arg4[%c0_22, %c0_23] : memref<4x128xf32, #tpu.memory_space<vmem>>, vector<4x128xf32>
    tpu.vector_store %arg4[%c0_22, %c0_23], %56 {strides = array<i32>} : memref<4x128xf32, #tpu.memory_space<vmem>>, vector<4x128xf32>,
    return
  }
}

</mosaic_0001>

<bundles_post_ra>
// kernel: openmax_forward.1
= control target key start
LH: loop header
LB: loop body
LE: loop exit
PB: predicated region body
PF: predicated region fallthrough
CT: control target
= control target key end

     0   :  { %9 = vsyncpa [#allocation3], 0  ;;  %s445_s0 = inlined_call_operand.vmem [shape: f32[4,128], index: 0, kind: input, shape index: {}]   ;;  %s446_s1 = inlined_call_operand.vmem [shape: f32[1,256], index: 1, kind: input, shape index: {}]   ;;  %s447_s2 = inlined_call_operand.hbm [shape: f32[256,128], index: 2, kind: input, shape index: {}]   ;;  %s448_s3 = inlined_call_operand.vmem [shape: f32[4,128], index: 3, kind: input, shape index: {}]   ;;  %s449_s4 = inlined_call_operand.hbm [shape: f32[4,128], index: 4, kind: output, shape index: {}]  }
   0x1   :  { %10 = vsyncpa [#allocation4], 0  ;;  %s367_s15 = smov [#allocation2]   ;;  %s319_s19 = scalar_lea.hbm %s447_s2, 4096 }
   0x2   :  { %s20_s16 = sshll.u32 %s367_s15, 4  ;;  %p320_p0 = scmp.ne.s32.totalorder %s447_s2, %s319_s19  ;;  %s21_s16 = int_to_ptr.vmem [resolvable:$true] %s20_s16 }
   0x3   :  { %p323_p1 = scmp.lt.u32.totalorder %s319_s19, %s447_s2 }
   0x5   :  { %p325_p2 = pnand %p323_p1, %p320_p0 }
   0x7   :  { %328 = shalt.err (!%p325_p2)
}
   0x8   :  { %s329_s24 = scalar_lea.vmem %s21_s16, 4096  ;;  %p334_p4 = scmp.lt.s32.totalorder %s21_s16, %s21_s16 }
   0x9   :  { %p330_p3 = scmp.ne.s32.totalorder %s21_s16, %s329_s24  ;;  %p335_p5 = scmp.lt.s32.totalorder %s329_s24, %s329_s24 }
   0xb   :  { %p336_p6 = por %p335_p5, %p334_p4 }
   0xd   :  { %p337_p7 = pnand %p336_p6, %p330_p3 }
   0xf   :  { %340 = shalt.err (!%p337_p7)
}
  0x10   :  { %s368_s25 = smov 128   ;;  %s369_s26 = smov 8  }
  0x11   :  { %26 = dma.hbm_to_vmem [thread:$0]  %s447_s2, 4096, %s21_s16, [#allocation3], %s368_s25, %s368_s25, %s369_s26  }
  0x12   :  { %363 = dma.done.wait [#allocation3], 4096  }
  0x13   :  { %364 = vsyncadd [#allocation3], 4294963200  ;;  %v66_v0 = vlaneseq  ;;  %v49_v1 = vld [vmem:[#allocation2 + $0x80] sm:$0xff]  ;;  %v50_v2 = vld [vmem:[#allocation2 + $0x88] sm:$0xff]  ;;  %vm158_vm0 = vcmask 1040384   ;;  %vm208_vm5 = vcmask 1043456  }
  0x14   :  { %v33_v3 = vld [vmem:[#allocation2] sm:$0xff]  ;;  %v271_v4 = vpack.c.bf16 %v50_v2, %v49_v1  ;;  %v34_v5 = vld [vmem:[#allocation2 + $0x8] sm:$0xff]  ;;  %v51_v6 = vld [vmem:[#allocation2 + $0x90] sm:$0xff]  ;;  %s370_s12 = smov [#allocation5]  }
  0x15   :  { %v52_v7 = vld [vmem:[#allocation2 + $0x98] sm:$0xff]  ;;  %v273_v8 = vpack.c.bf16 %v34_v5, %v33_v3  ;;  %v35_v10 = vld [vmem:[#allocation2 + $0x10] sm:$0xff]  ;;  %v53_v12 = vld [vmem:[#allocation2 + $0xa0] sm:$0xff]  ;;  %v67_v14 = vshrl.u32 %v66_v0, 7  ;;  %s227_s13 = sshll.u32 %s370_s12, 4  ;;  %s228_s13 = int_to_ptr.vmem [resolvable:$true] %s227_s13 }
  0x16   :  { %v275_v9 = vpack.c.bf16 %v52_v7, %v51_v6  ;;  %v36_v11 = vld [vmem:[#allocation2 + $0x18] sm:$0xff]  ;;  %272 = vmatprep.subr.bf16.mxu0 %v271_v4  ;;  %v54_v13 = vld [vmem:[#allocation2 + $0xa8] sm:$0xff]  ;;  %v37_v17 = vld [vmem:[#allocation2 + $0x20] sm:$0xff]  ;;  %p346_p9 = scmp.lt.s32.totalorder %s228_s13, %s228_s13 }
  0x17   :  { %274 = vmatpush3.bf16.msra.mxu0 %v273_v8  ;;  %v277_v15 = vpack.c.bf16 %v36_v11, %v35_v10  ;;  %v279_v16 = vpack.c.bf16 %v54_v13, %v53_v12  ;;  %v38_v18 = vld [vmem:[#allocation2 + $0x28] sm:$0xff]  ;;  %v55_v19 = vld [vmem:[#allocation2 + $0xb0] sm:$0xff]  ;;  %v56_v20 = vld [vmem:[#allocation2 + $0xb8] sm:$0xff]  ;;  %v72_v21 = vsub.s32 1, %v67_v14  ;;  %v412_v29 = vsub.s32 0, %v67_v14 }
  0x18   :  { %276 = vmatprep.subr.bf16.mxu0 %v275_v9  ;;  %v281_v22 = vpack.c.bf16 %v38_v18, %v37_v17  ;;  %v283_v23 = vpack.c.bf16 %v56_v20, %v55_v19  ;;  %v39_v24 = vld [vmem:[#allocation2 + $0x30] sm:$0xff]  ;;  %v40_v25 = vld [vmem:[#allocation2 + $0x38] sm:$0xff]  ;;  %v57_v26 = vld [vmem:[#allocation2 + $0xc0] sm:$0xff] }
  0x19   :  { %v58_v27 = vld [vmem:[#allocation2 + $0xc8] sm:$0xff]  ;;  %v32_v28 = vld [vmem:[%s446_s1] sm:$0x3]  ;;  %v285_v32 = vpack.c.bf16 %v40_v25, %v39_v24  ;;  %v59_v38 = vld [vmem:[#allocation2 + $0xd0] sm:$0xff] }
  0x1a   :  { %v73_v30 = vrot.slane %v32_v28, %v72_v21  ;;  %v146_v31 = vmul.f32 %v32_v28, %v32_v28  ;;  %v287_v33 = vpack.c.bf16 %v58_v27, %v57_v26  ;;  %v41_v34 = vld [vmem:[#allocation2 + $0x40] sm:$0xff]  ;;  %v42_v35 = vld [vmem:[#allocation2 + $0x48] sm:$0xff]  ;;  %v60_v39 = vld [vmem:[#allocation2 + $0xd8] sm:$0xff]  ;;  %v69_v60 = vrot.slane %v32_v28, %v412_v29 }
  0x1b   :  { %278 = vmatpush3.bf16.msra.mxu0 %v277_v15  ;;  %v289_v42 = vpack.c.bf16 %v42_v35, %v41_v34  ;;  %v291_v44 = vpack.c.bf16 %v60_v39, %v59_v38  ;;  %v43_v45 = vld [vmem:[#allocation2 + $0x50] sm:$0xff]  ;;  %v44_v46 = vld [vmem:[#allocation2 + $0x58] sm:$0xff]  ;;  %v61_v47 = vld [vmem:[#allocation2 + $0xe0] sm:$0xff] }
  0x1c   :  { %280 = vmatprep.subr.bf16.mxu0 %v279_v16  ;;  %140 = vmatprep.mubr.f32.mxu0 %v73_v30  ;;  %v151_v36 = vrot.slane %v146_v31, %v412_v29  ;;  %v155_v37 = vrot.slane %v146_v31, %v72_v21  ;;  %v62_v48 = vld [vmem:[#allocation2 + $0xe8] sm:$0xff]  ;;  %v293_v49 = vpack.c.bf16 %v44_v46, %v43_v45  ;;  %v45_v51 = vld [vmem:[#allocation2 + $0x60] sm:$0xff]  ;;  %v63_v53 = vld [vmem:[#allocation2 + $0xf0] sm:$0xff] }
  0x1d   :  { %v295_v50 = vpack.c.bf16 %v62_v48, %v61_v47  ;;  %v46_v52 = vld [vmem:[#allocation2 + $0x68] sm:$0xff]  ;;  %v64_v54 = vld [vmem:[#allocation2 + $0xf8] sm:$0xff]  ;;  %v47_v57 = vld [vmem:[#allocation2 + $0x70] sm:$0xff] }
  0x1e   :  { %v159_v40 = vsel %vm158_vm0, %v151_v36, 0.0  ;;  %v160_v41 = vsel %vm158_vm0, %v155_v37, 0.0  ;;  %v297_v55 = vpack.c.bf16 %v46_v52, %v45_v51  ;;  %v299_v56 = vpack.c.bf16 %v64_v54, %v63_v53  ;;  %v48_v58 = vld [vmem:[#allocation2 + $0x78] sm:$0xff]  ;;  %v167_v61 = vld [vmem:[%s448_s3 + $0x3] sm:$0x1] }
  0x1f   :  { %282 = vmatpush3.bf16.msra.mxu0 %v281_v22  ;;  %v161_v43 = vadd.f32 %v160_v41, %v159_v40  ;;  %v301_v59 = vpack.c.bf16 %v48_v58, %v47_v57  ;;  %v165_v9 = vld [vmem:[%s448_s3 + $0x1] sm:$0x1]  ;;  %v166_v12 = vld [vmem:[%s448_s3 + $0x2] sm:$0x1]  ;;  %v164_v18 = vld [vmem:[%s448_s3] sm:$0x1] }
  0x20   :  { %284 = vmatprep.subr.bf16.mxu0 %v283_v23  ;;  %v198_v35 = vld [vmem:[%s445_s0] sm:$0xf]  ;;  %s341_s0 = scalar_lea.vmem %s228_s13, 64 }
  0x21   :  { %162 = vadd.xlane.f32.xlu0 %v161_v43  ;;  %p342_p8 = scmp.ne.s32.totalorder %s228_s13, %s341_s0  ;;  %p347_p10 = scmp.lt.s32.totalorder %s341_s0, %s341_s0 }
  0x23   :  { %286 = vmatpush3.bf16.msra.mxu0 %v285_v32  ;;  %p348_p11 = por %p347_p10, %p346_p9 }
  0x24   :  { %288 = vmatprep.subr.bf16.mxu0 %v287_v33  ;;  %v205_v33 = vand.u32 127, %v66_v0 }
  0x25   :  { %p349_p12 = pnand %p348_p11, %p342_p8 }
  0x26   :  { %vm206_vm4 = vcmp.lt.s32.totalorder %v205_v33, 10 }
  0x27   :  { %290 = vmatpush3.bf16.msra.mxu0 %v289_v42 }
  0x28   :  { %292 = vmatprep.subr.bf16.mxu0 %v291_v44 }
  0x2b   :  { %294 = vmatpush3.bf16.msra.mxu0 %v293_v49 }
  0x2c   :  { %296 = vmatprep.subr.bf16.mxu0 %v295_v50 }
  0x2f   :  { %298 = vmatpush3.bf16.msra.mxu0 %v297_v55 }
  0x30   :  { %300 = vmatprep.subr.bf16.mxu0 %v299_v56 }
  0x33   :  { %302 = vmatpush3.bf16.msra.mxu0 %v301_v59 }
  0x36   :  { %141 = vmatmul.mubr.f32.vlgmr.msra.gmra.mrb[0].mxu0 %v69_v60 }
  0xae   :  { %v163_v62 = vpop.xlane.xlu0 %162 }
  0xaf   :  { %v168_v3 = vadd.f32 %v167_v61, %v163_v62 }
 0x109   :  { %v268_v63 = vpop.f32.mrb[0].mxu0 }
 0x10a   :  { %v269_v1 = vpop.f32.mrb[1].mxu0 }
 0x10b   :  { %v270_v2 = vadd.f32 %v269_v1, %v268_v63 }
 0x10d   :  { %v169_v4 = vmul.f32 2.0, %v270_v2 }
 0x10f   :  { %v170_v5 = vsub.f32 %v168_v3, %v169_v4 }
 0x111   :  { %v171_v6 = vmax.f32 %v170_v5, 0.0 }
 0x113   :  { %307 = vrsqrt.f32 %v171_v6  ;;  %vm174_vm1 = vcmp.eq.f32.partialorder %v171_v6, inf  ;;  %v177_v10 = vand.u32 2147483648, %v171_v6  ;;  %vm176_vm2 = vcmp.eq.f32.partialorder %v171_v6, 0.0 }
 0x11d   :  { %v308_v7 = vpop.eup %307 }
 0x11e   :  { %v173_v8 = vmul.f32 %v308_v7, %v171_v6 }
 0x120   :  { %v175_v11 = vsel %vm174_vm1, %v171_v6, %v173_v8 }
 0x121   :  { %v178_v13 = vsel %vm176_vm2, %v177_v10, %v175_v11 }
 0x122   :  { %v179_v14 = vsub.f32 %v178_v13, %v165_v9 }
 0x124   :  { %v180_v15 = vmul.f32 %v179_v14, %v166_v12 }
 0x126   :  { %v181_v16 = vmax.f32 %v180_v15, 1e-30  ;;  %vm187_vm3 = vcmp.gt.f32.partialorder %v180_v15, 0.0 }
 0x128   :  { %309 = vlog2.f32 %v181_v16 }
 0x132   :  { %v310_v17 = vpop.eup %309 }
 0x133   :  { %v183_v19 = vmul.f32 0.6931472, %v310_v17 }
 0x135   :  { %v184_v20 = vmul.f32 %v183_v19, %v164_v18 }
 0x137   :  { %v185_v21 = vmul.f32 1.442695, %v184_v20 }
 0x139   :  { %311 = vpow2.f32 %v185_v21 }
 0x143   :  { %v312_v22 = vpop.eup %311 }
 0x144   :  { %v188_v23 = vsub.f32 0.0, %v312_v22 }
 0x146   :  { %v189_v24 = vmul.f32 1.442695, %v188_v23 }
 0x148   :  { %313 = vpow2.f32 %v189_v24 }
 0x152   :  { %v314_v25 = vpop.eup %313 }
 0x153   :  { %v191_v26 = vsub.f32 1.0, %v314_v25 }
 0x155   :  { %v192_v27 = vsel %vm187_vm3, %v191_v26, 0.0 }
 0x156   :  { %v193_v28 = vmul.f32 %v192_v27, %v192_v27 }
 0x158   :  { %v194_v30 = vmul.f32 %v193_v28, %v193_v28 }
 0x15a   :  { %v195_v31 = vmul.f32 %v194_v30, %v194_v30 }
 0x15c   :  { %v196_v32 = vmul.f32 %v195_v31, %v193_v28 }
 0x15e   :  { %v197_v34 = vsub.f32 1.0, %v196_v32 }
 0x160   :  { %v202_v36 = vrot.slane %v197_v34, %v412_v29 }
 0x162   :  { %v203_v37 = vmul.f32 %v202_v36, %v198_v35 }
 0x164   :  { %v207_v38 = vsel %vm206_vm4, %v203_v37, -1e+30 }
 0x165   :  { %v209_v39 = vsel %vm208_vm5, %v207_v38, -inf }
 0x166   :  { %210 = vmax.xlane.f32.xlu0 %v209_v39 }
 0x1f3   :  { %v211_v40 = vpop.xlane.xlu0 %210 }
 0x1f4   :  { %v212_v41 = vsub.f32 %v207_v38, %v211_v40 }
 0x1f6   :  { %v213_v42 = vmul.f32 1.442695, %v212_v41 }
 0x1f8   :  { %315 = vpow2.f32 %v213_v42 }
 0x202   :  { %v316_v43 = vpop.eup %315 }
 0x203   :  { %v215_v44 = vsel %vm208_vm5, %v316_v43, 0.0 }
 0x204   :  { %216 = vadd.xlane.f32.xlu1 %v215_v44 }
 0x291   :  { %v217_v0 = vpop.xlane.xlu1 %216 }
 0x292   :  { %317 = vrcp.f32 %v217_v0 }
 0x29c   :  { %v318_v45 = vpop.eup %317 }
 0x29d   :  { %v219_v46 = vmul.f32 %v318_v45, %v316_v43 }
 0x29f   :  { %220 = vst [vmem:[#allocation5] sm:$0xf] %v219_v46 }
 0x2a0   :  { %352 = shalt.err (!%p349_p12)
}
 0x2a1   :  { %s353_s16 = scalar_lea.hbm %s449_s4, 64 }
 0x2a2   :  { %p354_p13 = scmp.ne.s32.totalorder %s449_s4, %s353_s16  ;;  %p357_p0 = scmp.lt.u32.totalorder %s353_s16, %s449_s4 }
 0x2a4   :  { %p359_p1 = pnand %p357_p0, %p354_p13 }
 0x2a6   :  { %362 = shalt.err (!%p359_p1)
}
 0x2a7   :  { %230 = dma.vmem_to_hbm [thread:$0]  %s228_s13, 64, %s449_s4, [#allocation4]  }
 0x2a8   :  { %365 = dma.done.wait [#allocation4], 64  }
 0x2a9   :  { %366 = vsyncadd [#allocation4], 4294967232 }
 0x2aa   :  { %234 = vsyncpa [#allocation3], 1 }
 0x2ab   :  { %235 = vsyncpa [#allocation4], 1 }

</bundles_post_ra>
